<compile_context>
chip_gen: v7x
topology: tpu7x:2x2x1
jax: 0.10.0
libtpu: 0.0.40
codegen_flags: <defaults>
</compile_context>

<pallas_src>
import jax
import jax.numpy as jnp
import numpy as np
from jax.experimental import pallas as pl
from jax.experimental.pallas import tpu as pltpu


def _round_up(x: int, m: int) -> int:
    return ((x + m - 1) // m) * m


def _choose_block_k(K: int, N: int, target_bytes: int = 1 << 20) -> int:
    """How many Hamiltonians to process per grid step (~1 MiB H per block)."""
    bk = max(1, target_bytes // (N * N * 4))
    mult = max(1, -(-128 // N))                 # keep BK*N >= 128 rows for MXU/vregs
    bk = max(mult, (bk // mult) * mult)
    return min(bk, _round_up(K, mult))          # don't pad far past K


def _system_stoquastic_kernel(h_ref, ut_ref, ub_ref, out_ref, acc_ref):
    g = pl.program_id(0)

    @pl.when(g == 0)
    def _init():
        acc_ref[...] = jnp.zeros_like(acc_ref)

    bk, n, _ = h_ref.shape
    # Row-stacked view of the BK Hamiltonians: (BK*N, N) (layout-preserving).
    h_rows = h_ref[...].reshape(bk * n, n)

    # Stage 1: B_k = H_k @ U^T for all k, fused into one big MXU matmul.
    b = jnp.dot(h_rows, ut_ref[...], preferred_element_type=jnp.float32)

    # Stage 2: A_k = U @ B_k as a single batched MXU matmul (U pre-broadcast
    # in HBM, resident in VMEM across the whole grid).
    a = jnp.einsum("kab,kbc->kac", ub_ref[...], b.reshape(bk, n, n),
                   preferred_element_type=jnp.float32)

    # Per-lane partial sums: reduce sublanes only, keep the lane axis; no
    # cross-lane reduce and no narrow store inside the loop.
    h_part = jnp.sum(h_rows, axis=0, keepdims=True)                          # (1, N)
    a_part = jnp.sum(jnp.abs(a).reshape(bk * n, n), axis=0, keepdims=True)   # (1, N)
    acc_ref[...] += h_part + a_part

    @pl.when(g == pl.num_programs(0) - 1)
    def _finalize():
        out_ref[...] = jnp.zeros_like(out_ref) + jnp.abs(jnp.sum(acc_ref[...]))


def system_stoquastic_loss(h_stack: jax.Array, U: jax.Array, *, block_k=None) -> jax.Array:
    """h_stack: (K, N, N) Hermitian matrices; U: (N, N).  Returns (1,) f32 loss."""
    h = jnp.asarray(h_stack, jnp.float32)
    U = jnp.asarray(U, jnp.float32)
    K, N, _ = h.shape

    bk = _choose_block_k(K, N) if block_k is None else block_k
    kpad = _round_up(K, bk)
    if kpad != K:
        # Zero Hamiltonians contribute exactly 0 to the loss.
        h = jnp.concatenate([h, jnp.zeros((kpad - K, N, N), jnp.float32)], axis=0)

    ut = U.T                                   # hoisted: one-time transpose in XLA
    ub = jnp.broadcast_to(U, (bk, N, N))       # batched LHS for stage 2; DMA'd once

    out = pl.pallas_call(
        _system_stoquastic_kernel,
        out_shape=jax.ShapeDtypeStruct((1, 1), jnp.float32),
        grid_spec=pltpu.PrefetchScalarGridSpec(
            num_scalar_prefetch=0,
            grid=(kpad // bk,),
            in_specs=[
                pl.BlockSpec((bk, N, N), lambda g: (g, 0, 0)),   # H block (streamed)
                pl.BlockSpec((N, N), lambda g: (0, 0)),          # U^T   (resident)
                pl.BlockSpec((bk, N, N), lambda g: (0, 0, 0)),   # bcast U (resident)
            ],
            out_specs=pl.BlockSpec((1, 1), lambda g: (0, 0)),    # written on last step
            scratch_shapes=[pltpu.VMEM((1, N), jnp.float32)],    # lane accumulator
        ),
        compiler_params=pltpu.CompilerParams(
            dimension_semantics=("arbitrary",),
            vmem_limit_bytes=48 * 1024 * 1024,
        ),
    )(h, ut, ub)
    return out.reshape((1,))   # match torch.zeros(1) shape


if __name__ == "__main__":
    key = jax.random.PRNGKey(0)
    k1, k2 = jax.random.split(key)

    # K local Hamiltonians of a 4-site spin-1/2 chain -> N = 16.
    K, N = 3, 16
    M = jax.random.normal(k1, (K, N, N), dtype=jnp.float32)
    h_stack = 0.5 * (M + jnp.swapaxes(M, -1, -2))        # real symmetric (Hermitian)
    U = jax.random.normal(k2, (N, N), dtype=jnp.float32)  # candidate "unitary"

    out = jax.block_until_ready(system_stoquastic_loss(h_stack, U))

    # Pure-JAX reference of the same forward pass (full-precision matmuls).
    A_ref = jnp.einsum("ab,kbc,dc->kad", U, h_stack, U,
                       precision=jax.lax.Precision.HIGHEST)
    ref = jnp.abs(jnp.sum(h_stack) + jnp.sum(jnp.abs(A_ref))).reshape((1,))

    assert out.shape == (1,)
    assert np.allclose(np.asarray(out), np.asarray(ref), rtol=1e-3, atol=1.0), (out, ref)

    print("KERNEL_OK")
</pallas_src>

<mosaic_0001>
module attributes {stable_mosaic.version = 11 : i64} {
  func.func @_system_stoquastic_kernel(%arg0: i32, %arg1: memref<8x16x16xf32, #tpu.memory_space<vmem>>, %arg2: memref<16x16xf32, #tpu.memory_space<vmem>>, %arg3: memref<8x16x16xf32, #tpu.memory_space<vmem>>, %arg4: memref<1x1xf32, #tpu.memory_space<vmem>>, %arg5: memref<1x16xf32, #tpu.memory_space<vmem>>) attributes {dimension_semantics = [#tpu.dimension_semantics<arbitrary>], iteration_bounds = array<i64: 1>, scalar_prefetch = 0 : i64, scratch_operands = 1 : i64, tpu.core_type = #tpu.core_type<tc>, window_params = [{transform_indices = @transform_0, window_bounds = array<i64: 8, 16, 16>}, {pipeline_mode = #tpu.pipeline_mode<synchronous>, transform_indices = @transform_1, window_bounds = array<i64: 16, 16>}, {pipeline_mode = #tpu.pipeline_mode<synchronous>, transform_indices = @transform_2, window_bounds = array<i64: 8, 16, 16>}, {pipeline_mode = #tpu.pipeline_mode<synchronous>, transform_indices = @transform_3, window_bounds = array<i64: 1, 1>}]} {
    %c0_i32 = arith.constant 0 : i32
    %0 = arith.cmpi eq, %arg0, %c0_i32 : i32
    %1 = arith.extui %0 : i1 to i32
    %c0_i32_0 = arith.constant 0 : i32
    %2 = arith.cmpi ne, %1, %c0_i32_0 : i32
    scf.if %2 {
      %cst_17 = arith.constant 0.000000e+00 : f32
      %23 = vector.broadcast %cst_17 : f32 to vector<1x16xf32>
      %c0_18 = arith.constant 0 : index
      %c0_19 = arith.constant 0 : index
      %24 = vector.load %arg5[%c0_18, %c0_19] : memref<1x16xf32, #tpu.memory_space<vmem>>, vector<1x16xf32>
      tpu.vector_store %arg5[%c0_18, %c0_19], %23 {strides = array<i32>} : memref<1x16xf32, #tpu.memory_space<vmem>>, vector<1x16xf32>,
    } else {
    }
    %c0 = arith.constant 0 : index
    %c0_1 = arith.constant 0 : index
    %c0_2 = arith.constant 0 : index
    %3 = vector.load %arg1[%c0, %c0_1, %c0_2] : memref<8x16x16xf32, #tpu.memory_space<vmem>>, vector<8x16x16xf32>
    %4 = vector.shape_cast %3 : vector<8x16x16xf32> to vector<128x16xf32>
    %c0_3 = arith.constant 0 : index
    %c0_4 = arith.constant 0 : index
    %5 = vector.load %arg2[%c0_3, %c0_4] : memref<16x16xf32, #tpu.memory_space<vmem>>, vector<16x16xf32>
    %cst = arith.constant dense<0.000000e+00> : vector<128x16xf32>
    %6 = tpu.matmul %4, %5, %cst {dimension_numbers = #tpu.dot_dimension_numbers<[1], [0], [0], [1], [0, 0, 1, 1], [], []>} : vector<128x16xf32>, vector<16x16xf32>, vector<128x16xf32> -> vector<128x16xf32>
    %c0_5 = arith.constant 0 : index
    %c0_6 = arith.constant 0 : index
    %c0_7 = arith.constant 0 : index
    %7 = vector.load %arg3[%c0_5, %c0_6, %c0_7] : memref<8x16x16xf32, #tpu.memory_space<vmem>>, vector<8x16x16xf32>
    %8 = vector.shape_cast %6 : vector<128x16xf32> to vector<8x16x16xf32>
    "tpu.trace_start"() <{level = 10 : i32, message = "kab,kbc->kac"}> : () -> ()
    %cst_8 = arith.constant dense<0.000000e+00> : vector<8x16x16xf32>
    %9 = tpu.matmul %7, %8, %cst_8 {dimension_numbers = #tpu.dot_dimension_numbers<[2], [1], [1], [2], [0, 0, 0, 1, 1, 2], [0], [0]>} : vector<8x16x16xf32>, vector<8x16x16xf32>, vector<8x16x16xf32> -> vector<8x16x16xf32>
    "tpu.trace_stop"() : () -> ()
    %cst_9 = arith.constant dense<0.000000e+00> : vector<16xf32>
    %10 = vector.multi_reduction <add>, %4, %cst_9 [0] : vector<128x16xf32> to vector<16xf32>
    %11 = vector.shape_cast %10 : vector<16xf32> to vector<1x16xf32>
    %12 = math.absf %9 : vector<8x16x16xf32>
    %13 = vector.shape_cast %12 : vector<8x16x16xf32> to vector<128x16xf32>
    %cst_10 = arith.constant dense<0.000000e+00> : vector<16xf32>
    %14 = vector.multi_reduction <add>, %13, %cst_10 [0] : vector<128x16xf32> to vector<16xf32>
    %15 = vector.shape_cast %14 : vector<16xf32> to vector<1x16xf32>
    %c0_11 = arith.constant 0 : index
    %c0_12 = arith.constant 0 : index
    %16 = vector.load %arg5[%c0_11, %c0_12] : memref<1x16xf32, #tpu.memory_space<vmem>>, vector<1x16xf32>
    %17 = arith.addf %11, %15 : vector<1x16xf32>
    %18 = arith.addf %16, %17 : vector<1x16xf32>
    %c0_13 = arith.constant 0 : index
    %c0_14 = arith.constant 0 : index
    %19 = vector.load %arg5[%c0_13, %c0_14] : memref<1x16xf32, #tpu.memory_space<vmem>>, vector<1x16xf32>
    tpu.vector_store %arg5[%c0_13, %c0_14], %18 {strides = array<i32>} : memref<1x16xf32, #tpu.memory_space<vmem>>, vector<1x16xf32>,
    %c0_i32_15 = arith.constant 0 : i32
    %20 = arith.cmpi eq, %arg0, %c0_i32_15 : i32
    %21 = arith.extui %20 : i1 to i32
    %c0_i32_16 = arith.constant 0 : i32
    %22 = arith.cmpi ne, %21, %c0_i32_16 : i32
    scf.if %22 {
      %cst_17 = arith.constant 0.000000e+00 : f32
      %23 = vector.broadcast %cst_17 : f32 to vector<1x1xf32>
      %c0_18 = arith.constant 0 : index
      %c0_19 = arith.constant 0 : index
      %24 = vector.load %arg5[%c0_18, %c0_19] : memref<1x16xf32, #tpu.memory_space<vmem>>, vector<1x16xf32>
      %25 = vector.shape_cast %24 : vector<1x16xf32> to vector<1x1x16xf32>
      %cst_20 = arith.constant dense<0.000000e+00> : vector<1xf32>
      %26 = vector.multi_reduction <add>, %25, %cst_20 [1, 2] : vector<1x1x16xf32> to vector<1xf32>
      %27 = vector.shape_cast %26 : vector<1xf32> to vector<1x1x1xf32>
      %28 = vector.extract %27[0, 0, 0] : f32 from vector<1x1x1xf32>
      %29 = math.absf %28 : f32
      %30 = vector.broadcast %29 : f32 to vector<1x1xf32>
      %31 = arith.addf %23, %30 : vector<1x1xf32>
      %c0_21 = arith.constant 0 : index
      %c0_22 = arith.constant 0 : index
      %32 = vector.load %arg4[%c0_21, %c0_22] : memref<1x1xf32, #tpu.memory_space<vmem>>, vector<1x1xf32>
      tpu.vector_store %arg4[%c0_21, %c0_22], %31 {strides = array<i32>} : memref<1x1xf32, #tpu.memory_space<vmem>>, vector<1x1xf32>,
    } else {
    }
    return
  }
  func.func @transform_0(%arg0: i32) -> (i32, i32, i32) {
    %c0_i32 = arith.constant 0 : i32
    %c0_i32_0 = arith.constant 0 : i32
    %c0_i32_1 = arith.constant 0 : i32
    return %arg0, %c0_i32, %c0_i32_0 : i32, i32, i32
  }
  func.func @transform_1(%arg0: i32) -> (i32, i32) {
    %c0_i32 = arith.constant 0 : i32
    %c0_i32_0 = arith.constant 0 : i32
    %c0_i32_1 = arith.constant 0 : i32
    return %c0_i32, %c0_i32_0 : i32, i32
  }
  func.func @transform_2(%arg0: i32) -> (i32, i32, i32) {
    %c0_i32 = arith.constant 0 : i32
    %c0_i32_0 = arith.constant 0 : i32
    %c0_i32_1 = arith.constant 0 : i32
    %c0_i32_2 = arith.constant 0 : i32
    return %c0_i32, %c0_i32_0, %c0_i32_1 : i32, i32, i32
  }
  func.func @transform_3(%arg0: i32) -> (i32, i32) {
    %c0_i32 = arith.constant 0 : i32
    %c0_i32_0 = arith.constant 0 : i32
    %c0_i32_1 = arith.constant 0 : i32
    return %c0_i32, %c0_i32_0 : i32, i32
  }
}

</mosaic_0001>

<bundles_post_ra>
// kernel: tpu_custom_call.1
= control target key start
LH: loop header
LB: loop body
LE: loop exit
PB: predicated region body
PF: predicated region fallthrough
CT: control target
= control target key end

     0   :  { %8 = vsyncpa [#allocation4], 0  ;;  %s1535_s0 = inlined_call_operand.hbm [shape: f32[8,16,16], index: 0, kind: input, shape index: {}]   ;;  %s1536_s1 = inlined_call_operand.hbm [shape: f32[16,16], index: 1, kind: input, shape index: {}]   ;;  %s1537_s2 = inlined_call_operand.hbm [shape: f32[8,16,16], index: 2, kind: input, shape index: {}]   ;;  %s1538_s3 = inlined_call_operand.hbm [shape: f32[1,1], index: 3, kind: output, shape index: {}]  }
   0x1   :  { %9 = vsyncpa [#allocation7], 0 }
   0x2   :  { %10 = vsyncpa [#allocation5], 0  ;;  %s1373_s12 = smov [#allocation6]   ;;  %s1374_s14 = smov [#allocation3]  }
   0x3   :  { %s28_s13 = sshll.u32 %s1373_s12, 4  ;;  %s16_s15 = sshll.u32 %s1374_s14, 4  ;;  %s29_s13 = int_to_ptr.vmem [resolvable:$true] %s28_s13  ;;  %s1400_s15 = int_to_ptr.vmem [resolvable:$true] %s16_s15 }
   0x4   :  { %s1279_s18 = scalar_lea.hbm %s1536_s1, 256 }
   0x5   :  { %p1280_p0 = scmp.ne.s32.totalorder %s1536_s1, %s1279_s18  ;;  %p1283_p1 = scmp.lt.u32.totalorder %s1279_s18, %s1536_s1 }
   0x7   :  { %p1285_p2 = pnand %p1283_p1, %p1280_p0 }
   0x9   :  { %1288 = shalt.err (!%p1285_p2)
}
   0xa   :  { %s1289_s23 = scalar_lea.vmem %s29_s13, 256  ;;  %p1294_p4 = scmp.lt.s32.totalorder %s29_s13, %s29_s13 }
   0xb   :  { %p1290_p3 = scmp.ne.s32.totalorder %s29_s13, %s1289_s23  ;;  %p1295_p5 = scmp.lt.s32.totalorder %s1289_s23, %s1289_s23 }
   0xd   :  { %p1296_p6 = por %p1295_p5, %p1294_p4 }
   0xf   :  { %p1297_p7 = pnand %p1296_p6, %p1290_p3 }
  0x11   :  { %1300 = shalt.err (!%p1297_p7)
}
  0x12   :  { %s1375_s24 = smov 128   ;;  %s1376_s25 = smov 8  }
  0x13   :  { %34 = dma.hbm_to_vmem [thread:$0]  %s1536_s1, 256, %s29_s13, [#allocation7], %s1375_s24, %s1375_s24, %s1376_s25  }
  0x14   :  { %s1301_s30 = scalar_lea.hbm %s1535_s0, 2048 }
  0x15   :  { %p1302_p8 = scmp.ne.s32.totalorder %s1535_s0, %s1301_s30  ;;  %p1305_p9 = scmp.lt.u32.totalorder %s1301_s30, %s1535_s0 }
  0x17   :  { %p1307_p10 = pnand %p1305_p9, %p1302_p8 }
  0x19   :  { %1310 = shalt.err (!%p1307_p10)
}
  0x1a   :  { %s1311_s8 = scalar_lea.vmem %s1400_s15, 2048  ;;  %p1316_p12 = scmp.lt.s32.totalorder %s1400_s15, %s1400_s15 }
  0x1b   :  { %p1312_p11 = scmp.ne.s32.totalorder %s1400_s15, %s1311_s8  ;;  %p1317_p13 = scmp.lt.s32.totalorder %s1311_s8, %s1311_s8 }
  0x1d   :  { %p1318_p0 = por %p1317_p13, %p1316_p12 }
  0x1f   :  { %p1319_p1 = pnand %p1318_p0, %p1312_p11 }
  0x21   :  { %1322 = shalt.err (!%p1319_p1)
}
  0x22   :  { %22 = dma.hbm_to_vmem [thread:$0]  %s1535_s0, 2048, %s1400_s15, [#allocation4], %s1375_s24, %s1375_s24, %s1376_s25  }
  0x23   :  { %s1377_s10 = smov [#allocation8]   ;;  %s1323_s14 = scalar_lea.hbm %s1537_s2, 2048 }
  0x24   :  { %s40_s11 = sshll.u32 %s1377_s10, 4  ;;  %p1324_p2 = scmp.ne.s32.totalorder %s1537_s2, %s1323_s14  ;;  %s41_s11 = int_to_ptr.vmem [resolvable:$true] %s40_s11 }
  0x25   :  { %p1327_p3 = scmp.lt.u32.totalorder %s1323_s14, %s1537_s2 }
  0x27   :  { %p1329_p4 = pnand %p1327_p3, %p1324_p2 }
  0x29   :  { %1332 = shalt.err (!%p1329_p4)
}
  0x2a   :  { %s1333_s20 = scalar_lea.vmem %s41_s11, 2048  ;;  %p1338_p6 = scmp.lt.s32.totalorder %s41_s11, %s41_s11 }
  0x2b   :  { %p1334_p5 = scmp.ne.s32.totalorder %s41_s11, %s1333_s20  ;;  %p1339_p7 = scmp.lt.s32.totalorder %s1333_s20, %s1333_s20 }
  0x2d   :  { %p1340_p8 = por %p1339_p7, %p1338_p6 }
  0x2f   :  { %p1341_p9 = pnand %p1340_p8, %p1334_p5 }
  0x31   :  { %1344 = shalt.err (!%p1341_p9)
}
  0x32   :  { %46 = dma.hbm_to_vmem [thread:$0]  %s1537_s2, 2048, %s41_s11, [#allocation7], %s1375_s24, %s1375_s24, %s1376_s25  }
  0x33   :  { %1367 = dma.done.wait [#allocation4], 2048  }
  0x34   :  { %1368 = vsyncadd [#allocation4], 4294965248 }
  0x35   :  { %1369 = dma.done.wait [#allocation7], 2304  }
  0x36   :  { %1370 = vsyncadd [#allocation7], 4294964992  ;;  %vm80_vm0 = vcmask 130048   ;;  %v78_v0 = vld [vmem:[#allocation6] sm:$0xff]  ;;  %v79_v1 = vld [vmem:[#allocation6 + $0x8] sm:$0xff]  ;;  %vm60_vm1 = vcmask 122880  }
  0x37   :  { %v62_v2 = vld [vmem:[#allocation3] sm:$0xff]  ;;  %v1234_v3 = vpack.c.bf16 %v79_v1, %v78_v0  ;;  %v63_v4 = vld [vmem:[#allocation3 + $0x8] sm:$0xff]  ;;  %v64_v6 = vld [vmem:[#allocation3 + $0x10] sm:$0xff]  ;;  %s1379_s2 = smov [#allocation9]   ;;  %vm1050_vm2 = vcmask 0  }
  0x38   :  { %1154 = vmatprep.mubr.msk.f32.mxu0 %vm80_vm0, %v62_v2  ;;  %v938_v5 = vsel %vm80_vm0, %v62_v2, 0.0  ;;  %v939_v7 = vsel %vm80_vm0, %v63_v4, 0.0  ;;  %v941_v8 = vsel %vm80_vm0, %v64_v6, 0.0  ;;  %v65_v10 = vld [vmem:[#allocation3 + $0x18] sm:$0xff]  ;;  %v66_v13 = vld [vmem:[#allocation3 + $0x20] sm:$0xff]  ;;  %v67_v16 = vld [vmem:[#allocation3 + $0x28] sm:$0xff] }
  0x39   :  { %1235 = vmatprep.subr.bf16.mxu0 %v1234_v3  ;;  %v940_v9 = vadd.f32 %v939_v7, %v938_v5  ;;  %v943_v11 = vsel %vm80_vm0, %v65_v10, 0.0  ;;  %v945_v14 = vsel %vm80_vm0, %v66_v13, 0.0  ;;  %v947_v17 = vsel %vm80_vm0, %v67_v16, 0.0  ;;  %v68_v19 = vld [vmem:[#allocation3 + $0x30] sm:$0xff]  ;;  %v69_v22 = vld [vmem:[#allocation3 + $0x38] sm:$0xff]  ;;  %v70_v25 = vld [vmem:[#allocation3 + $0x40] sm:$0xff] }
  0x3a   :  { %1237 = vmatpush3.bf16.msra.mxu0 %v1234_v3  ;;  %v949_v20 = vsel %vm80_vm0, %v68_v19, 0.0  ;;  %v951_v23 = vsel %vm80_vm0, %v69_v22, 0.0  ;;  %v953_v26 = vsel %vm80_vm0, %v70_v25, 0.0  ;;  %v71_v28 = vld [vmem:[#allocation3 + $0x48] sm:$0xff]  ;;  %v72_v31 = vld [vmem:[#allocation3 + $0x50] sm:$0xff]  ;;  %v73_v34 = vld [vmem:[#allocation3 + $0x58] sm:$0xff] }
  0x3b   :  { %v942_v12 = vadd.f32 %v941_v8, %v940_v9  ;;  %v955_v29 = vsel %vm80_vm0, %v71_v28, 0.0  ;;  %v957_v32 = vsel %vm80_vm0, %v72_v31, 0.0  ;;  %v959_v35 = vsel %vm80_vm0, %v73_v34, 0.0  ;;  %v74_v37 = vld [vmem:[#allocation3 + $0x60] sm:$0xff]  ;;  %v75_v40 = vld [vmem:[#allocation3 + $0x68] sm:$0xff]  ;;  %v76_v43 = vld [vmem:[#allocation3 + $0x70] sm:$0xff] }
  0x3c   :  { %v961_v38 = vsel %vm80_vm0, %v74_v37, 0.0  ;;  %v963_v41 = vsel %vm80_vm0, %v75_v40, 0.0  ;;  %v965_v44 = vsel %vm80_vm0, %v76_v43, 0.0  ;;  %v77_v46 = vld [vmem:[#allocation3 + $0x78] sm:$0xff]  ;;  %v274_v50 = vld [vmem:[#allocation8] sm:$0xff]  ;;  %v276_v58 = vld [vmem:[#allocation8 + $0x10] sm:$0xff] }
  0x3d   :  { %1155 = vmatmul.mubr.msk.f32.vlgmr.msra.gmra.mrb[0].mxu0 %vm80_vm0, %v63_v4  ;;  %v944_v15 = vadd.f32 %v943_v11, %v942_v12  ;;  %v967_v47 = vsel %vm80_vm0, %v77_v46, 0.0  ;;  %1182 = vmatprep.mubr.msk.f32.mxu1 %vm80_vm0, %v274_v50  ;;  %v275_v56 = vld [vmem:[#allocation8 + $0x8] sm:$0xff]  ;;  %v277_v61 = vld [vmem:[#allocation8 + $0x18] sm:$0xff]  ;;  %v278_v63 = vld [vmem:[#allocation8 + $0x20] sm:$0xff]  ;;  %s1058_s21 = sshll.u32 %s1379_s2, 4  ;;  %s1059_s21 = int_to_ptr.vmem [resolvable:$true] %s1058_s21 }
  0x3e   :  { %1157 = vmatprep.mubr.msk.f32.mxu0 %vm80_vm0, %v64_v6  ;;  %v279_v2 = vld [vmem:[#allocation8 + $0x28] sm:$0xff]  ;;  %v280_v4 = vld [vmem:[#allocation8 + $0x30] sm:$0xff]  ;;  %v281_v7 = vld [vmem:[#allocation8 + $0x38] sm:$0xff]  ;;  %s1345_s24 = scalar_lea.vmem %s1059_s21, 16  ;;  %s1349_s25 = scalar_lea.vmem %s1059_s21, 32 }
  0x3f   :  { %v946_v18 = vadd.f32 %v945_v14, %v944_v15  ;;  %v282_v9 = vld [vmem:[#allocation8 + $0x40] sm:$0xff]  ;;  %v283_v12 = vld [vmem:[#allocation8 + $0x48] sm:$0xff]  ;;  %v284_v14 = vld [vmem:[#allocation8 + $0x50] sm:$0xff]  ;;  %p1346_p10 = scmp.ne.s32.totalorder %s1059_s21, %s1345_s24  ;;  %p1350_p11 = scmp.lt.s32.totalorder %s1059_s21, %s1059_s21 }
  0x40   :  { %p1351_p12 = scmp.lt.s32.totalorder %s1349_s25, %s1345_s24 }
  0x41   :  { %1158 = vmatmul.mubr.msk.f32.gmra.mrb[2].mxu0 %vm80_vm0, %v65_v10  ;;  %v948_v21 = vadd.f32 %v947_v17, %v946_v18  ;;  %v285_v17 = vld [vmem:[#allocation8 + $0x58] sm:$0xff] }
  0x42   :  { %1160 = vmatprep.mubr.msk.f32.mxu0 %vm80_vm0, %v66_v13  ;;  %p1352_p13 = por %p1351_p12, %p1350_p11 }
  0x43   :  { %v950_v24 = vadd.f32 %v949_v20, %v948_v21 }
  0x44   :  { %p1353_p0 = pnand %p1352_p13, %p1346_p10 }
  0x45   :  { %1161 = vmatmul.mubr.msk.f32.gmra.mrb[4].mxu0 %vm80_vm0, %v67_v16  ;;  %v952_v27 = vadd.f32 %v951_v23, %v950_v24  ;;  %v288_v24 = vld [vmem:[#allocation8 + $0x70] sm:$0xff] }
  0x46   :  { %1163 = vmatprep.mubr.msk.f32.mxu0 %vm80_vm0, %v68_v19  ;;  %v286_v19 = vld [vmem:[#allocation8 + $0x60] sm:$0xff] }
  0x47   :  { %v954_v30 = vadd.f32 %v953_v26, %v952_v27  ;;  %v1378_v26 = vmov 0.0  }
  0x48   :  { %61 = vst.msk [vmem:[#allocation2] sm:$0x1] %vm60_vm1, %v1378_v26 }
  0x49   :  { %1164 = vmatmul.mubr.msk.f32.gmra.mrb[6].mxu0 %vm80_vm0, %v69_v22  ;;  %v956_v33 = vadd.f32 %v955_v29, %v954_v30  ;;  %v287_v22 = vld [vmem:[#allocation8 + $0x68] sm:$0xff] }
  0x4a   :  { %1166 = vmatprep.mubr.msk.f32.mxu0 %vm80_vm0, %v70_v25  ;;  %v289_v25 = vld [vmem:[#allocation8 + $0x78] sm:$0xff] }
  0x4b   :  { %v958_v36 = vadd.f32 %v957_v32, %v956_v33 }
  0x4d   :  { %1167 = vmatmul.mubr.msk.f32.gmra.mrb[8].mxu0 %vm80_vm0, %v71_v28  ;;  %v960_v39 = vadd.f32 %v959_v35, %v958_v36 }
  0x4e   :  { %1169 = vmatprep.mubr.msk.f32.mxu0 %vm80_vm0, %v72_v31 }
  0x4f   :  { %v962_v42 = vadd.f32 %v961_v38, %v960_v39 }
  0x51   :  { %1170 = vmatmul.mubr.msk.f32.gmra.mrb[10].mxu0 %vm80_vm0, %v73_v34  ;;  %v964_v45 = vadd.f32 %v963_v41, %v962_v42 }
  0x52   :  { %1172 = vmatprep.mubr.msk.f32.mxu0 %vm80_vm0, %v74_v37 }
  0x53   :  { %v966_v48 = vadd.f32 %v965_v44, %v964_v45 }
  0x55   :  { %1173 = vmatmul.mubr.msk.f32.gmra.mrb[12].mxu0 %vm80_vm0, %v75_v40  ;;  %v1482_v49 = vadd.f32 %v967_v47, %v966_v48 }
  0x56   :  { %1175 = vmatprep.mubr.msk.f32.mxu0 %vm80_vm0, %v76_v43 }
  0x59   :  { %1176 = vmatmul.mubr.msk.f32.gmra.mrb[14].mxu0 %vm80_vm0, %v77_v46 }
 0x110   :  { %v1156_v51 = vpop.f32.mrb[0].mxu0 }
 0x111   :  { %v195_v52 = vpop.f32.mrb[1].mxu0 }
 0x112   :  { %v1238_v53 = vpack.c.bf16 %v1156_v51, %v195_v52 }
 0x114   :  { %v1159_v54 = vpop.f32.mrb[2].mxu0  ;;  %1239 = vmatprep.subr.bf16.mxu1 %v1238_v53 }
 0x115   :  { %v205_v55 = vpop.f32.mrb[3].mxu0  ;;  %1241 = vmatpush3.bf16.msra.mxu1 %v1238_v53 }
 0x116   :  { %v1242_v57 = vpack.c.bf16 %v1159_v54, %v205_v55 }
 0x118   :  { %v1162_v59 = vpop.f32.mrb[4].mxu0  ;;  %1183 = vmatmul.mubr.msk.f32.vlgmr.msra.gmra.mrb[0].mxu1 %vm80_vm0, %v275_v56  ;;  %1243 = vmatprep.subr.bf16.mxu1 %v1242_v57 }
 0x119   :  { %v215_v60 = vpop.f32.mrb[5].mxu0  ;;  %1245 = vmatpush3.bf16.msra.mxu1 %v1242_v57  ;;  %1189 = vmatprep.mubr.msk.f32.mxu1 %vm80_vm0, %v276_v58 }
 0x11a   :  { %v1246_v62 = vpack.c.bf16 %v1162_v59, %v215_v60 }
 0x11c   :  { %v1165_v0 = vpop.f32.mrb[6].mxu0  ;;  %1190 = vmatmul.mubr.msk.f32.vlgmr.msra.gmra.mrb[2].mxu1 %vm80_vm0, %v277_v61  ;;  %1247 = vmatprep.subr.bf16.mxu1 %v1246_v62 }
 0x11d   :  { %v225_v1 = vpop.f32.mrb[7].mxu0  ;;  %1249 = vmatpush3.bf16.msra.mxu1 %v1246_v62  ;;  %1196 = vmatprep.mubr.msk.f32.mxu1 %vm80_vm0, %v278_v63 }
 0x11e   :  { %v1250_v3 = vpack.c.bf16 %v1165_v0, %v225_v1 }
 0x120   :  { %v1168_v5 = vpop.f32.mrb[8].mxu0  ;;  %1197 = vmatmul.mubr.msk.f32.vlgmr.msra.gmra.mrb[4].mxu1 %vm80_vm0, %v279_v2  ;;  %1251 = vmatprep.subr.bf16.mxu1 %v1250_v3 }
 0x121   :  { %v235_v6 = vpop.f32.mrb[9].mxu0  ;;  %1253 = vmatpush3.bf16.msra.mxu1 %v1250_v3  ;;  %1203 = vmatprep.mubr.msk.f32.mxu1 %vm80_vm0, %v280_v4 }
 0x122   :  { %v1254_v8 = vpack.c.bf16 %v1168_v5, %v235_v6 }
 0x124   :  { %v1171_v10 = vpop.f32.mrb[10].mxu0  ;;  %1204 = vmatmul.mubr.msk.f32.vlgmr.msra.gmra.mrb[6].mxu1 %vm80_vm0, %v281_v7  ;;  %1255 = vmatprep.subr.bf16.mxu1 %v1254_v8 }
 0x125   :  { %v245_v11 = vpop.f32.mrb[11].mxu0  ;;  %1257 = vmatpush3.bf16.msra.mxu1 %v1254_v8  ;;  %1210 = vmatprep.mubr.msk.f32.mxu1 %vm80_vm0, %v282_v9  ;;  %v969_v9 = vrot.slane %v1482_v49, 4 }
 0x126   :  { %v1258_v13 = vpack.c.bf16 %v1171_v10, %v245_v11 }
 0x128   :  { %v1174_v15 = vpop.f32.mrb[12].mxu0  ;;  %1211 = vmatmul.mubr.msk.f32.vlgmr.msra.gmra.mrb[8].mxu1 %vm80_vm0, %v283_v12  ;;  %1259 = vmatprep.subr.bf16.mxu1 %v1258_v13 }
 0x129   :  { %v255_v16 = vpop.f32.mrb[13].mxu0  ;;  %1261 = vmatpush3.bf16.msra.mxu1 %v1258_v13  ;;  %1217 = vmatprep.mubr.msk.f32.mxu1 %vm80_vm0, %v284_v14 }
 0x12a   :  { %v1262_v18 = vpack.c.bf16 %v1174_v15, %v255_v16 }
 0x12c   :  { %v1177_v20 = vpop.f32.mrb[14].mxu0  ;;  %1218 = vmatmul.mubr.msk.f32.vlgmr.msra.gmra.mrb[10].mxu1 %vm80_vm0, %v285_v17  ;;  %1263 = vmatprep.subr.bf16.mxu1 %v1262_v18 }
 0x12d   :  { %v265_v21 = vpop.f32.mrb[15].mxu0  ;;  %1265 = vmatpush3.bf16.msra.mxu1 %v1262_v18  ;;  %1224 = vmatprep.mubr.msk.f32.mxu1 %vm80_vm0, %v286_v19  ;;  %v970_v18 = vadd.f32 %v969_v9, %v1482_v49 }
 0x12e   :  { %v1266_v23 = vpack.c.bf16 %v1177_v20, %v265_v21 }
 0x12f   :  { %v971_v26 = vrot.slane %v970_v18, 2 }
 0x130   :  { %1225 = vmatmul.mubr.msk.f32.vlgmr.msra.gmra.mrb[12].mxu1 %vm80_vm0, %v287_v22  ;;  %1267 = vmatprep.subr.bf16.mxu1 %v1266_v23 }
 0x131   :  { %1269 = vmatpush3.bf16.msra.mxu1 %v1266_v23  ;;  %1231 = vmatprep.mubr.msk.f32.mxu1 %vm80_vm0, %v288_v24 }
 0x134   :  { %1232 = vmatmul.mubr.msk.f32.vlgmr.msra.gmra.mrb[14].mxu1 %vm80_vm0, %v289_v25 }
 0x1eb   :  { %v1184_v27 = vpop.f32.mrb[0].mxu1 }
 0x1ec   :  { %v976_v28 = vand.u32 2147483647, %v1184_v27  ;;  %v362_v29 = vpop.f32.mrb[1].mxu1 }
 0x1ed   :  { %v975_v30 = vand.u32 2147483647, %v362_v29 }
 0x1ee   :  { %v992_v31 = vsel %vm80_vm0, %v976_v28, 0.0 }
 0x1ef   :  { %v991_v32 = vsel %vm80_vm0, %v975_v30, 0.0  ;;  %v1191_v33 = vpop.f32.mrb[2].mxu1  ;;  %v972_v30 = vadd.f32 %v971_v26, %v970_v18 }
 0x1f0   :  { %v993_v34 = vadd.f32 %v992_v31, %v991_v32  ;;  %v443_v35 = vpop.f32.mrb[3].mxu1  ;;  %v978_v36 = vand.u32 2147483647, %v1191_v33 }
 0x1f1   :  { %v977_v37 = vand.u32 2147483647, %v443_v35  ;;  %v973_v33 = vrot.slane %v972_v30, 1 }
 0x1f2   :  { %v996_v42 = vsel %vm80_vm0, %v978_v36, 0.0 }
 0x1f3   :  { %v994_v38 = vsel %vm80_vm0, %v977_v37, 0.0  ;;  %v1198_v39 = vpop.f32.mrb[4].mxu1  ;;  %v974_v35 = vadd.f32 %v973_v33, %v972_v30 }
 0x1f4   :  { %v995_v40 = vadd.f32 %v994_v38, %v993_v34  ;;  %v524_v41 = vpop.f32.mrb[5].mxu1  ;;  %v980_v43 = vand.u32 2147483647, %v1198_v39  ;;  %v1028_v38 = vld [vmem:[#allocation2] sm:$0x1] }
 0x1f5   :  { %v979_v44 = vand.u32 2147483647, %v524_v41 }
 0x1f6   :  { %v997_v45 = vadd.f32 %v996_v42, %v995_v40  ;;  %v1000_v51 = vsel %vm80_vm0, %v980_v43, 0.0 }
 0x1f7   :  { %v998_v46 = vsel %vm80_vm0, %v979_v44, 0.0  ;;  %v1205_v47 = vpop.f32.mrb[6].mxu1 }
 0x1f8   :  { %v999_v48 = vadd.f32 %v998_v46, %v997_v45  ;;  %v605_v50 = vpop.f32.mrb[7].mxu1  ;;  %v982_v52 = vand.u32 2147483647, %v1205_v47 }
 0x1f9   :  { %v981_v53 = vand.u32 2147483647, %v605_v50 }
 0x1fa   :  { %v1001_v54 = vadd.f32 %v1000_v51, %v999_v48  ;;  %v1004_v59 = vsel %vm80_vm0, %v982_v52, 0.0 }
 0x1fb   :  { %v1002_v55 = vsel %vm80_vm0, %v981_v53, 0.0  ;;  %v1212_v56 = vpop.f32.mrb[8].mxu1 }
 0x1fc   :  { %v1003_v57 = vadd.f32 %v1002_v55, %v1001_v54  ;;  %v686_v58 = vpop.f32.mrb[9].mxu1  ;;  %v984_v60 = vand.u32 2147483647, %v1212_v56 }
 0x1fd   :  { %v983_v61 = vand.u32 2147483647, %v686_v58 }
 0x1fe   :  { %v1005_v62 = vadd.f32 %v1004_v59, %v1003_v57  ;;  %v1008_v3 = vsel %vm80_vm0, %v984_v60, 0.0 }
 0x1ff   :  { %v1006_v63 = vsel %vm80_vm0, %v983_v61, 0.0  ;;  %v1219_v0 = vpop.f32.mrb[10].mxu1 }
 0x200   :  { %v1007_v1 = vadd.f32 %v1006_v63, %v1005_v62  ;;  %v767_v2 = vpop.f32.mrb[11].mxu1  ;;  %v986_v4 = vand.u32 2147483647, %v1219_v0 }
 0x201   :  { %v985_v5 = vand.u32 2147483647, %v767_v2 }
 0x202   :  { %v1009_v6 = vadd.f32 %v1008_v3, %v1007_v1  ;;  %v1012_v12 = vsel %vm80_vm0, %v986_v4, 0.0 }
 0x203   :  { %v1010_v7 = vsel %vm80_vm0, %v985_v5, 0.0  ;;  %v1226_v8 = vpop.f32.mrb[12].mxu1 }
 0x204   :  { %v1011_v10 = vadd.f32 %v1010_v7, %v1009_v6  ;;  %v848_v11 = vpop.f32.mrb[13].mxu1  ;;  %v988_v13 = vand.u32 2147483647, %v1226_v8 }
 0x205   :  { %v987_v14 = vand.u32 2147483647, %v848_v11 }
 0x206   :  { %v1013_v15 = vadd.f32 %v1012_v12, %v1011_v10  ;;  %v1016_v21 = vsel %vm80_vm0, %v988_v13, 0.0 }
 0x207   :  { %v1014_v16 = vsel %vm80_vm0, %v987_v14, 0.0  ;;  %v1233_v17 = vpop.f32.mrb[14].mxu1 }
 0x208   :  { %v1015_v19 = vadd.f32 %v1014_v16, %v1013_v15  ;;  %v929_v20 = vpop.f32.mrb[15].mxu1  ;;  %v990_v22 = vand.u32 2147483647, %v1233_v17 }
 0x209   :  { %v989_v23 = vand.u32 2147483647, %v929_v20 }
 0x20a   :  { %v1017_v24 = vadd.f32 %v1016_v21, %v1015_v19  ;;  %v1020_v28 = vsel %vm80_vm0, %v990_v22, 0.0 }
 0x20b   :  { %v1018_v25 = vsel %vm80_vm0, %v989_v23, 0.0 }
 0x20c   :  { %v1019_v27 = vadd.f32 %v1018_v25, %v1017_v24 }
 0x20e   :  { %v1021_v29 = vadd.f32 %v1020_v28, %v1019_v27 }
 0x210   :  { %v1022_v31 = vrot.slane %v1021_v29, 4 }
 0x212   :  { %v1023_v32 = vadd.f32 %v1022_v31, %v1021_v29 }
 0x214   :  { %v1024_v34 = vrot.slane %v1023_v32, 2 }
 0x216   :  { %v1025_v49 = vadd.f32 %v1024_v34, %v1023_v32 }
 0x218   :  { %v1026_v36 = vrot.slane %v1025_v49, 1 }
 0x21a   :  { %v1027_v37 = vadd.f32 %v1026_v36, %v1025_v49 }
 0x21c   :  { %v1029_v39 = vadd.f32 %v1027_v37, %v974_v35 }
 0x21e   :  { %v1030_v40 = vadd.f32 %v1029_v39, %v1028_v38 }
 0x220   :  { %1032 = vst.msk [vmem:[#allocation2] sm:$0x1] %vm60_vm1, %v1030_v40 }
 0x227   :  { %v1036_v41 = vld [vmem:[#allocation2] sm:$0x1] }
 0x228   :  { %v1037_v42 = vsel %vm60_vm1, %v1036_v41, 0.0 }
 0x229   :  { %1038 = vadd.xlane.f32.xlu0 %v1037_v42 }
 0x2b6   :  { %v1039_v43 = vpop.xlane.xlu0 %1038 }
 0x2b7   :  { %v1040_v44 = vrot.slane %v1039_v43, 4 }
 0x2b9   :  { %v1041_v45 = vadd.f32 %v1040_v44, %v1039_v43 }
 0x2bb   :  { %v1042_v46 = vrot.slane %v1041_v45, 2 }
 0x2bd   :  { %v1043_v47 = vadd.f32 %v1042_v46, %v1041_v45 }
 0x2bf   :  { %v1044_v48 = vrot.slane %v1043_v47, 1 }
 0x2c1   :  { %v1045_v50 = vadd.f32 %v1044_v48, %v1043_v47 }
 0x2c3   :  { %1270 = vpush %v1045_v50 }
 0x2f4   :  { %s1271_s22 = spop %1270 }
 0x2f5   :  { %s1047_s23 = sand.u32 2147483647, %s1271_s22 }
 0x2f6   :  { %v1048_v51 = vstv %s1047_s23 }
 0x2f7   :  { %1051 = vst.msk [vmem:[#allocation9] sm:$0x1] %vm1050_vm2, %v1048_v51 }
 0x2f8   :  { %1356 = shalt.err (!%p1353_p0)
}
 0x2f9   :  { %s1357_s28 = scalar_lea.hbm %s1538_s3, 16 }
 0x2fa   :  { %p1358_p1 = scmp.ne.s32.totalorder %s1538_s3, %s1357_s28  ;;  %p1361_p2 = scmp.lt.u32.totalorder %s1357_s28, %s1538_s3 }
 0x2fc   :  { %p1363_p3 = pnand %p1361_p2, %p1358_p1 }
 0x2fe   :  { %1366 = shalt.err (!%p1363_p3)
}
 0x2ff   :  { %1061 = dma.vmem_to_hbm [thread:$0]  %s1059_s21, 16, %s1538_s3, [#allocation5]  }
 0x300   :  { %1371 = dma.done.wait [#allocation5], 16  }
 0x301   :  { %1372 = vsyncadd [#allocation5], 4294967280 }
 0x302   :  { %1065 = vsyncpa [#allocation4], 1 }
 0x303   :  { %1066 = vsyncpa [#allocation7], 1 }
 0x304   :  { %1067 = vsyncpa [#allocation5], 1 }

</bundles_post_ra>
